<compile_context>
chip_gen: v6e
topology: v6e:2x2x1
jax: 0.10.0
libtpu: 0.0.40
codegen_flags: <defaults>
</compile_context>

<pallas_src>
import functools

import jax
import jax.numpy as jnp
from jax.experimental import pallas as pl
from jax.experimental.pallas import tpu as pltpu

_A = -0.5               # module default self.a
_LANE = 128             # vreg lane width
_MAX_BLOCK_ROWS = 4096  # (4096, 128) f32 = 2 MiB per buffer
_TINY_ROWS = 64         # <= 64 rows (32 KiB f32): one block, one grid step
_MIN_BLOCK_ROWS = 256   # medium sizes: aim for >= ~8 grid steps of >= 256 rows


def _round_up(x, m):
    return ((x + m - 1) // m) * m


def _cubic_kernel(x_ref, o_ref, *, a):
    # Upcast in-kernel (VPU converts are cheap) rather than paying an HBM pass.
    x = x_ref[...].astype(jnp.float32)
    t = jnp.abs(x)

    # Horner form of the two Keys polynomials; W(x) = W(|x|).
    #   |x| < 1 :  (a+2)t^3 - (a+3)t^2 + 1
    #   1<=|x|<2:  a t^3 - 5a t^2 + 8a t - 4a
    p_inner = ((a + 2.0) * t - (a + 3.0)) * t * t + 1.0
    p_outer = ((a * t - 5.0 * a) * t + 8.0 * a) * t - 4.0 * a

    # Two compares total; m_outer derived by subtraction (saves a compare, the
    # boolean &, and one bool->f32 convert — a real win on v7x where this
    # kernel is VALU-bound).
    m_inner = (t < 1.0).astype(jnp.float32)
    m_lt2 = (t < 2.0).astype(jnp.float32)
    m_outer = m_lt2 - m_inner

    # Mask-multiply (not jnp.where) so NaN inputs yield NaN, matching the
    # i*y mask-sum in the PyTorch reference (masks are 0 for NaN, 0*NaN = NaN).
    y = m_inner * p_inner + m_outer * p_outer
    o_ref[...] = y.astype(o_ref.dtype)


def cubic_kernel_func(x, a=_A):
    """Elementwise cubic interpolation weight function, computed in Pallas."""
    orig_shape = x.shape
    orig_dtype = x.dtype
    n = x.size

    xf = x.reshape(-1)  # keep original dtype; the kernel upcasts internally

    # Lane-dense 2D slab (rows, 128).  A flat pad only happens when n is not a
    # multiple of 128 (the (2,4,16,16) example is 2048 -> no pad / no slice).
    rows = pl.cdiv(n, _LANE)
    pad_elems = rows * _LANE - n
    if pad_elems:
        xf = jnp.pad(xf, (0, pad_elems))
    x2d = xf.reshape(rows, _LANE)

    if rows <= _TINY_ROWS:
        # Tiny input: one block covering the whole slab (block == full array
        # dims satisfies the (8,128) divisibility rule), single grid step.
        block_rows = rows
    else:
        # Aim for ~8 grid steps of at least _MIN_BLOCK_ROWS rows, capped at
        # _MAX_BLOCK_ROWS (2 MiB f32 per buffer).  block_rows is a multiple of
        # 8 so (block_rows, 128) satisfies the (8,128) rule; the row axis is
        # NOT padded — Pallas masks the partial last block.
        block_rows = min(
            _MAX_BLOCK_ROWS,
            max(_MIN_BLOCK_ROWS, _round_up(pl.cdiv(rows, 8), 8)),
        )
        if block_rows >= rows:
            block_rows = rows  # degenerate medium case: full-array single block

    grid = (pl.cdiv(rows, block_rows),)

    out2d = pl.pallas_call(
        functools.partial(_cubic_kernel, a=a),
        out_shape=jax.ShapeDtypeStruct((rows, _LANE), orig_dtype),
        grid_spec=pltpu.PrefetchScalarGridSpec(
            num_scalar_prefetch=0,
            grid=grid,
            in_specs=[pl.BlockSpec((block_rows, _LANE), lambda i: (i, 0))],
            out_specs=pl.BlockSpec((block_rows, _LANE), lambda i: (i, 0)),
        ),
        compiler_params=pltpu.CompilerParams(
            # "parallel" lets the grid axis shard across both TensorCores on v7x.
            dimension_semantics=("parallel",),
        ),
    )(x2d)

    out = out2d.reshape(-1)
    if pad_elems:
        out = out[:n]
    return out.reshape(orig_shape)


def _reference(x, a=_A):
    """Pure-JAX reference mirroring the PyTorch forward exactly."""
    x = x.astype(jnp.float32)
    i1 = ((x >= -2) & (x < -1)).astype(x.dtype)
    i2 = ((x >= -1) & (x < 0)).astype(x.dtype)
    i3 = ((x >= 0) & (x < 1)).astype(x.dtype)
    i4 = ((x >= 1) & (x < 2)).astype(x.dtype)
    y1 = a * (-x) ** 3 - 5 * a * (-x) ** 2 + 8 * a * (-x) - 4 * a
    y2 = (2 + a) * (-x) ** 3 - (3 + a) * (-x) ** 2 + 1
    y3 = (2 + a) * x ** 3 - (3 + a) * x ** 2 + 1
    y4 = a * x ** 3 - 5 * a * x ** 2 + 8 * a * x - 4 * a
    return i1 * y1 + i2 * y2 + i3 * y3 + i4 * y4


if __name__ == "__main__":
    key = jax.random.PRNGKey(0)
    # NCHW input, values spanning all branch intervals [-3, 3].
    x = jax.random.uniform(key, (2, 4, 16, 16), dtype=jnp.float32,
                           minval=-3.0, maxval=3.0)

    y = cubic_kernel_func(x)
    jax.block_until_ready(y)

    y_ref = _reference(x)
    assert y.shape == x.shape and y.dtype == x.dtype
    assert jnp.allclose(y, y_ref, atol=1e-5, rtol=1e-5)

    # Exercise the multi-step tiled path too (medium size, ragged row count).
    x_big = jax.random.uniform(jax.random.PRNGKey(1), (3, 5, 73, 129),
                               dtype=jnp.float32, minval=-3.0, maxval=3.0)
    y_big = cubic_kernel_func(x_big)
    jax.block_until_ready(y_big)
    assert jnp.allclose(y_big, _reference(x_big), atol=1e-5, rtol=1e-5)

    print("KERNEL_OK")
</pallas_src>

<mosaic_0001>
module attributes {stable_mosaic.version = 11 : i64} {
  func.func @_cubic_kernel(%arg0: i32, %arg1: memref<16x128xf32, #tpu.memory_space<vmem>>, %arg2: memref<16x128xf32, #tpu.memory_space<vmem>>) attributes {dimension_semantics = [#tpu.dimension_semantics<parallel>], iteration_bounds = array<i64: 1>, scalar_prefetch = 0 : i64, scratch_operands = 0 : i64, tpu.core_type = #tpu.core_type<tc>, window_params = [{transform_indices = @transform_0, window_bounds = array<i64: 16, 128>}, {transform_indices = @transform_1, window_bounds = array<i64: 16, 128>}]} {
    %c0 = arith.constant 0 : index
    %c0_0 = arith.constant 0 : index
    %0 = vector.load %arg1[%c0, %c0_0] : memref<16x128xf32, #tpu.memory_space<vmem>>, vector<16x128xf32>
    %1 = math.absf %0 : vector<16x128xf32>
    %cst = arith.constant 1.500000e+00 : f32
    %2 = vector.broadcast %cst : f32 to vector<16x128xf32>
    %3 = arith.mulf %2, %1 : vector<16x128xf32>
    %cst_1 = arith.constant 2.500000e+00 : f32
    %4 = vector.broadcast %cst_1 : f32 to vector<16x128xf32>
    %5 = arith.subf %3, %4 : vector<16x128xf32>
    %6 = arith.mulf %5, %1 : vector<16x128xf32>
    %7 = arith.mulf %6, %1 : vector<16x128xf32>
    %cst_2 = arith.constant 1.000000e+00 : f32
    %8 = vector.broadcast %cst_2 : f32 to vector<16x128xf32>
    %9 = arith.addf %7, %8 : vector<16x128xf32>
    %cst_3 = arith.constant -5.000000e-01 : f32
    %10 = vector.broadcast %cst_3 : f32 to vector<16x128xf32>
    %11 = arith.mulf %10, %1 : vector<16x128xf32>
    %cst_4 = arith.constant -2.500000e+00 : f32
    %12 = vector.broadcast %cst_4 : f32 to vector<16x128xf32>
    %13 = arith.subf %11, %12 : vector<16x128xf32>
    %14 = arith.mulf %13, %1 : vector<16x128xf32>
    %cst_5 = arith.constant -4.000000e+00 : f32
    %15 = vector.broadcast %cst_5 : f32 to vector<16x128xf32>
    %16 = arith.addf %14, %15 : vector<16x128xf32>
    %17 = arith.mulf %16, %1 : vector<16x128xf32>
    %cst_6 = arith.constant -2.000000e+00 : f32
    %18 = vector.broadcast %cst_6 : f32 to vector<16x128xf32>
    %19 = arith.subf %17, %18 : vector<16x128xf32>
    %cst_7 = arith.constant 1.000000e+00 : f32
    %20 = vector.broadcast %cst_7 : f32 to vector<16x128xf32>
    %21 = arith.cmpf olt, %1, %20 : vector<16x128xf32>
    %22 = arith.extui %21 : vector<16x128xi1> to vector<16x128xi32>
    %23 = arith.sitofp %22 : vector<16x128xi32> to vector<16x128xf32>
    %cst_8 = arith.constant 2.000000e+00 : f32
    %24 = vector.broadcast %cst_8 : f32 to vector<16x128xf32>
    %25 = arith.cmpf olt, %1, %24 : vector<16x128xf32>
    %26 = arith.extui %25 : vector<16x128xi1> to vector<16x128xi32>
    %27 = arith.sitofp %26 : vector<16x128xi32> to vector<16x128xf32>
    %28 = arith.subf %27, %23 : vector<16x128xf32>
    %29 = arith.mulf %23, %9 : vector<16x128xf32>
    %30 = arith.mulf %28, %19 : vector<16x128xf32>
    %31 = arith.addf %29, %30 : vector<16x128xf32>
    %c0_9 = arith.constant 0 : index
    %c0_10 = arith.constant 0 : index
    %32 = vector.load %arg2[%c0_9, %c0_10] : memref<16x128xf32, #tpu.memory_space<vmem>>, vector<16x128xf32>
    tpu.vector_store %arg2[%c0_9, %c0_10], %31 {strides = array<i32>} : memref<16x128xf32, #tpu.memory_space<vmem>>, vector<16x128xf32>,
    return
  }
  func.func @transform_0(%arg0: i32) -> (i32, i32) {
    %c0_i32 = arith.constant 0 : i32
    %c0_i32_0 = arith.constant 0 : i32
    return %arg0, %c0_i32 : i32, i32
  }
  func.func @transform_1(%arg0: i32) -> (i32, i32) {
    %c0_i32 = arith.constant 0 : i32
    %c0_i32_0 = arith.constant 0 : i32
    return %arg0, %c0_i32 : i32, i32
  }
}

</mosaic_0001>

<bundles_post_ra>
// kernel: tpu_custom_call.1
= control target key start
LH: loop header
LB: loop body
LE: loop exit
PB: predicated region body
PF: predicated region fallthrough
CT: control target
= control target key end

     0   :  { %6 = vsyncpa [#allocation3], 0  ;;  %s174_s0 = inlined_call_operand.hbm [shape: f32[16,128], index: 0, kind: input, shape index: {}]   ;;  %s175_s1 = inlined_call_operand.hbm [shape: f32[16,128], index: 1, kind: output, shape index: {}]  }
   0x1   :  { %7 = vsyncpa [#allocation4], 0  ;;  %s147_s6 = smov [#allocation2]  }
   0x2   :  { %s13_s7 = sshll.u32 %s147_s6, 4  ;;  %s14_s7 = int_to_ptr.vmem [resolvable:$true] %s13_s7 }
   0x3   :  { %s111_s8 = scalar_lea.vmem %s14_s7, 256  ;;  %p116_p1 = scmp.lt.s32.totalorder %s14_s7, %s14_s7 }
   0x4   :  { %p112_p0 = scmp.ne.s32.totalorder %s14_s7, %s111_s8  ;;  %p117_p2 = scmp.lt.s32.totalorder %s111_s8, %s111_s8 }
   0x6   :  { %p118_p3 = por %p117_p2, %p116_p1 }
   0x8   :  { %p119_p4 = pnand %p118_p3, %p112_p0 }
   0xa   :  { %122 = shalt.err (!%p119_p4)
}
   0xb   :  { %s148_s9 = smov 128   ;;  %s149_s10 = smov 8  }
   0xc   :  { %19 = dma.hbm_to_vmem [thread:$0]  %s174_s0, 256, %s14_s7, [#allocation3], %s148_s9, %s148_s9, %s149_s10  }
   0xd   :  { %143 = dma.done.wait [#allocation3], 256  }
   0xe   :  { %144 = vsyncadd [#allocation3], 4294967040  ;;  %v23_v0 = vld [vmem:[#allocation2] sm:$0xff]  ;;  %v24_v1 = vld [vmem:[#allocation2 + $0x8] sm:$0xff]  ;;  %v150_v14 = vmov 0.0   ;;  %s151_s0 = smov [#allocation5]  }
   0xf   :  { %v25_v2 = vand.u32 2147483647, %v23_v0  ;;  %v26_v3 = vand.u32 2147483647, %v24_v1  ;;  %s76_s13 = sshll.u32 %s151_s0, 4  ;;  %s77_s13 = int_to_ptr.vmem [resolvable:$true] %s76_s13 }
  0x10   :  { %s123_s14 = scalar_lea.vmem %s77_s13, 256  ;;  %p128_p6 = scmp.lt.s32.totalorder %s77_s13, %s77_s13 }
  0x11   :  { %v27_v4 = vmul.f32 1.5, %v25_v2  ;;  %v37_v5 = vmul.f32 -0.5, %v25_v2  ;;  %v28_v6 = vmul.f32 1.5, %v26_v3  ;;  %v38_v7 = vmul.f32 -0.5, %v26_v3  ;;  %p124_p5 = scmp.ne.s32.totalorder %s77_s13, %s123_s14  ;;  %p129_p7 = scmp.lt.s32.totalorder %s123_s14, %s123_s14 }
  0x12   :  { %vm49_vm0 = vcmp.lt.f32.partialorder %v25_v2, 1.0  ;;  %vm55_vm1 = vcmp.lt.f32.partialorder %v25_v2, 2.0  ;;  %vm50_vm2 = vcmp.lt.f32.partialorder %v26_v3, 1.0  ;;  %vm56_vm3 = vcmp.lt.f32.partialorder %v26_v3, 2.0 }
  0x13   :  { %v88_v8 = vadd.f32 -2.5, %v27_v4  ;;  %v90_v9 = vadd.f32 2.5, %v37_v5  ;;  %v89_v10 = vadd.f32 -2.5, %v28_v6  ;;  %v91_v11 = vadd.f32 2.5, %v38_v7  ;;  %p130_p8 = por %p129_p7, %p128_p6 }
  0x14   :  { %v94_v15 = vsel %vm49_vm0, 1.0, %v150_v14  ;;  %v96_v16 = vsel %vm55_vm1, 1.0, %v150_v14  ;;  %v95_v21 = vsel %vm50_vm2, 1.0, %v150_v14  ;;  %v97_v22 = vsel %vm56_vm3, 1.0, %v150_v14 }
  0x15   :  { %v31_v12 = vmul.f32 %v88_v8, %v25_v2  ;;  %v41_v13 = vmul.f32 %v90_v9, %v25_v2  ;;  %v32_v17 = vmul.f32 %v89_v10, %v26_v3  ;;  %v42_v18 = vmul.f32 %v91_v11, %v26_v3  ;;  %p131_p9 = pnand %p130_p8, %p124_p5 }
  0x16   :  { %v61_v27 = vsub.f32 %v96_v16, %v94_v15  ;;  %v62_v30 = vsub.f32 %v97_v22, %v95_v21 }
  0x17   :  { %v33_v19 = vmul.f32 %v31_v12, %v25_v2  ;;  %v43_v20 = vadd.f32 -4.0, %v41_v13  ;;  %v34_v23 = vmul.f32 %v32_v17, %v26_v3  ;;  %v44_v24 = vadd.f32 -4.0, %v42_v18 }
  0x19   :  { %v35_v25 = vadd.f32 1.0, %v33_v19  ;;  %v45_v26 = vmul.f32 %v43_v20, %v25_v2  ;;  %v36_v28 = vadd.f32 1.0, %v34_v23  ;;  %v46_v29 = vmul.f32 %v44_v24, %v26_v3 }
  0x1b   :  { %v92_v31 = vadd.f32 2.0, %v45_v26  ;;  %v63_v32 = vmul.f32 %v94_v15, %v35_v25  ;;  %v93_v33 = vadd.f32 2.0, %v46_v29  ;;  %v64_v34 = vmul.f32 %v95_v21, %v36_v28 }
  0x1d   :  { %v65_v35 = vmul.f32 %v92_v31, %v61_v27  ;;  %v66_v36 = vmul.f32 %v93_v33, %v62_v30 }
  0x1f   :  { %v67_v37 = vadd.f32 %v65_v35, %v63_v32  ;;  %v68_v38 = vadd.f32 %v66_v36, %v64_v34 }
  0x21   :  { %69 = vst [vmem:[#allocation5] sm:$0xff] %v67_v37  ;;  %70 = vst [vmem:[#allocation5 + $0x8] sm:$0xff] %v68_v38 }
  0x22   :  { %134 = shalt.err (!%p131_p9)
}
  0x23   :  { %82 = dma.vmem_to_hbm [thread:$0]  %s77_s13, 256, %s175_s1, [#allocation4], %s148_s9, %s148_s9, %s149_s10  }
  0x24   :  { %145 = dma.done.wait [#allocation4], 256  }
  0x25   :  { %146 = vsyncadd [#allocation4], 4294967040 }
  0x26   :  { %86 = vsyncpa [#allocation3], 1 }
  0x27   :  { %87 = vsyncpa [#allocation4], 1 }

</bundles_post_ra>
